<compile_context>
chip_gen: v7x
topology: tpu7x:2x2x1
jax: 0.10.0
libtpu: 0.0.40
codegen_flags: <defaults>
</compile_context>

<pallas_src>
import functools

import jax
import jax.numpy as jnp
from jax import lax
from jax.experimental import pallas as pl
from jax.experimental.pallas import tpu as pltpu

_LANES = 128
_MAX_BLOCK_ROWS = 2048   # (2048, 128) f32 tile = 1 MiB/buffer; VMEM-safe on v5e/v6e/v7x
_ROW_ALIGN = 32          # sublane packing for f32 (8) / bf16 (16) / int8 (32)


def _cdiv(a, b):
    return -(-a // b)


def _round_up(a, b):
    return _cdiv(a, b) * b


def _focal_loss_kernel(x_ref, t_ref, out_ref, *, alpha, gamma, reduction,
                       block_rows, rem_last):
    """Sigmoid focal loss on one (block_rows, 128) tile.

    x_ref, t_ref : (block_rows, 128) VMEM tiles (native dtypes, cast to f32 here)
    out_ref      : (block_rows, 128) tile in the logits dtype   (reduction == 'none')
                   (8, 128) f32 per-block partial sums          (reduction in {'sum','mean'})
    """
    x = x_ref[...].astype(jnp.float32)
    t = t_ref[...].astype(jnp.float32)

    # One exp per element, shared by sigmoid and the numerically-stable BCE term.
    e = jnp.exp(-jnp.abs(x))
    inv = pl.reciprocal(1.0 + e, approx=True)          # EUP slot, not a VPU divide chain
    p = jnp.where(x >= 0, inv, e * inv)                # sigmoid(x)
    ce = jnp.maximum(x, 0.0) - x * t + jnp.log1p(e)    # BCE-with-logits, 'none'

    p_t = p * t + (1.0 - p) * (1.0 - t)
    q = 1.0 - p_t
    if gamma == 0:
        loss = ce
    elif float(gamma).is_integer():
        loss = ce * lax.integer_pow(q, int(gamma))     # gamma=2 -> q*q on the VPU
    else:
        loss = ce * (q ** gamma)                       # genuine pow only for non-integer gamma

    if alpha >= 0:
        loss = (alpha * t + (1.0 - alpha) * (1.0 - t)) * loss

    if reduction == "none":
        # OOB rows of a ragged last block are masked on store by Pallas; the
        # wrapper slices [:n], so no in-kernel masking is needed on this path.
        out_ref[...] = loss.astype(out_ref.dtype)
        return

    def _write(vals):
        # (block_rows, 128) -> (8, 128) partial sum: vreg-aligned sublane groups,
        # pure VPU adds, no cross-lane reduce inside the kernel.
        out_ref[...] = vals.reshape(block_rows // 8, 8, _LANES).sum(axis=0)

    if rem_last >= block_rows * _LANES:
        _write(loss)                                   # statically no padded tail anywhere
    else:
        last = pl.num_programs(0) - 1

        @pl.when(pl.program_id(0) != last)
        def _():
            _write(loss)                               # unmasked fast path for full blocks

        @pl.when(pl.program_id(0) == last)
        def _():
            # Block-relative index vs. a *static* remainder: only the last block
            # pays the iota/compare/select, and there is no int32 overflow even
            # when the total element count exceeds 2^31.
            row = lax.broadcasted_iota(jnp.int32, (block_rows, _LANES), 0)
            col = lax.broadcasted_iota(jnp.int32, (block_rows, _LANES), 1)
            _write(jnp.where(row * _LANES + col < rem_last, loss, 0.0))


def focal_loss_bce(logits, targets, *, alpha=0.25, gamma=2.0, reduction="mean"):
    """JAX / Pallas equivalent of FocalLossBCE.forward.

    logits : (N, C) or (N,) logits. If last dim > 1, class 1 is used (binary head).
    targets: (N,) labels (float / bf16 / int8 / int32 / bool).
    """
    if reduction not in ("none", "sum", "mean"):
        raise ValueError(f"unknown reduction {reduction!r}")

    if logits.ndim > 1 and logits.shape[-1] > 1:
        # Binary head: take the class-1 logit (matches the PyTorch module).
        # TODO(synk): this column slice stays a wrapper-side XLA op (fuses under jit);
        # an Element-indexed BlockSpec on the class dim would waste lane density.
        logits = logits[:, 1]
    logits = logits.reshape(-1)
    targets = targets.reshape(-1)

    # Keep narrow / native dtypes across the HBM boundary; cast to f32 in-kernel.
    if logits.dtype not in (jnp.float32, jnp.bfloat16):
        logits = logits.astype(jnp.float32)
    out_dtype = logits.dtype
    if targets.dtype == jnp.bool_:
        targets = targets.astype(jnp.int8)             # 1 byte/elem on the wire
    elif targets.dtype not in (jnp.float32, jnp.bfloat16, jnp.int8, jnp.int32):
        targets = targets.astype(jnp.float32)

    n = logits.shape[0]
    pad = (-n) % _LANES                                # <= 127 elements, 0 when lane-aligned
    if pad:
        logits = jnp.pad(logits, (0, pad))
        targets = jnp.pad(targets, (0, pad))
    rows = (n + pad) // _LANES
    x2 = logits.reshape(rows, _LANES)
    t2 = targets.reshape(rows, _LANES)

    block_rows = _round_up(rows, _ROW_ALIGN)
    if block_rows > 8 * _ROW_ALIGN:
        # Enough work to split: aim for >= 2 grid blocks so both v7x TensorCores
        # get a share; costs only one extra ~0.35 us grid step on single-TC parts.
        block_rows = _round_up(_cdiv(rows, 2), _ROW_ALIGN)
    block_rows = min(block_rows, _MAX_BLOCK_ROWS)
    num_blocks = _cdiv(rows, block_rows)
    rem_last = n - (num_blocks - 1) * block_rows * _LANES   # static, in (0, block_rows*128]

    kernel = functools.partial(
        _focal_loss_kernel, alpha=alpha, gamma=gamma, reduction=reduction,
        block_rows=block_rows, rem_last=rem_last)

    # TODO(synk): if xprof shows exposed DMA at the larger tiles, sweep
    # pipeline_mode=pl.Buffered(3) on these two input specs.
    in_specs = [
        pl.BlockSpec((block_rows, _LANES), lambda i: (i, 0)),
        pl.BlockSpec((block_rows, _LANES), lambda i: (i, 0)),
    ]

    if reduction == "none":
        out_shape = jax.ShapeDtypeStruct((rows, _LANES), out_dtype)
        out_specs = pl.BlockSpec((block_rows, _LANES), lambda i: (i, 0))
    else:
        out_shape = jax.ShapeDtypeStruct((num_blocks, 8, _LANES), jnp.float32)
        out_specs = pl.BlockSpec((None, 8, _LANES), lambda i: (i, 0, 0))

    out = pl.pallas_call(
        kernel,
        out_shape=out_shape,
        grid=(num_blocks,),
        in_specs=in_specs,
        out_specs=out_specs,
        # TODO(synk): verify on v7x xprof that this single "parallel" axis lands on
        # both TensorCores; if not, switch to pltpu.CORE_PARALLEL.
        compiler_params=pltpu.CompilerParams(dimension_semantics=("parallel",)),
    )(x2, t2)

    if reduction == "none":
        return out.reshape(-1)[:n]

    total = jnp.sum(out)            # tiny (num_blocks, 8, 128) f32 reduce in XLA
    if reduction == "mean":
        total = total / n           # true n, not padded size
    return total.astype(out_dtype)


def _focal_loss_ref(logits, targets, alpha=0.25, gamma=2.0, reduction="mean"):
    """Pure-JAX reference of torchvision.ops.sigmoid_focal_loss (class-1 slice applied)."""
    if logits.ndim > 1 and logits.shape[-1] > 1:
        logits = logits[:, 1]
    x = logits.reshape(-1).astype(jnp.float32)
    t = targets.reshape(-1).astype(jnp.float32)
    p = jax.nn.sigmoid(x)
    ce = jnp.maximum(x, 0.0) - x * t + jnp.log1p(jnp.exp(-jnp.abs(x)))
    p_t = p * t + (1 - p) * (1 - t)
    loss = ce * (1 - p_t) ** gamma
    if alpha >= 0:
        loss = (alpha * t + (1 - alpha) * (1 - t)) * loss
    if reduction == "mean":
        return jnp.mean(loss)
    if reduction == "sum":
        return jnp.sum(loss)
    return loss


if __name__ == "__main__":
    key = jax.random.PRNGKey(0)
    k1, k2 = jax.random.split(key)

    N, C = 8, 2  # small binary-classification batch: logits (N, 2), labels (N,)
    logits = jax.random.normal(k1, (N, C), dtype=jnp.float32)
    targets_f = jax.random.bernoulli(k2, p=0.5, shape=(N,)).astype(jnp.float32)
    targets_i = targets_f.astype(jnp.int32)

    # approx reciprocal in the sigmoid trims a few low-order bits -> tolerance ~2e-3.
    for targets in (targets_f, targets_i):
        for reduction in ("mean", "sum", "none"):
            out = jax.block_until_ready(
                focal_loss_bce(logits, targets, alpha=0.25, gamma=2.0, reduction=reduction)
            )
            ref = _focal_loss_ref(logits, targets, alpha=0.25, gamma=2.0, reduction=reduction)
            assert jnp.allclose(out, ref, atol=2e-3, rtol=2e-3), (reduction, out, ref)

    print("KERNEL_OK")
</pallas_src>

<mosaic_0001>
module attributes {stable_mosaic.version = 11 : i64} {
  func.func @_focal_loss_kernel(%arg0: i32, %arg1: memref<32x128xf32, #tpu.memory_space<vmem>>, %arg2: memref<32x128xf32, #tpu.memory_space<vmem>>, %arg3: memref<1x8x128xf32, #tpu.memory_space<vmem>>) attributes {dimension_semantics = [#tpu.dimension_semantics<parallel>], iteration_bounds = array<i64: 1>, scalar_prefetch = 0 : i64, scratch_operands = 0 : i64, tpu.core_type = #tpu.core_type<tc>, window_params = [{transform_indices = @transform_0, window_bounds = array<i64: 32, 128>}, {transform_indices = @transform_1, window_bounds = array<i64: 32, 128>}, {transform_indices = @transform_2, window_bounds = array<i64: 1, 8, 128>}]} {
    %c0 = arith.constant 0 : index
    %c0_0 = arith.constant 0 : index
    %0 = vector.load %arg1[%c0, %c0_0] : memref<32x128xf32, #tpu.memory_space<vmem>>, vector<32x128xf32>
    %c0_1 = arith.constant 0 : index
    %c0_2 = arith.constant 0 : index
    %1 = vector.load %arg2[%c0_1, %c0_2] : memref<32x128xf32, #tpu.memory_space<vmem>>, vector<32x128xf32>
    %2 = math.absf %0 : vector<32x128xf32>
    %cst = arith.constant 0.000000e+00 : f32
    %3 = vector.broadcast %cst : f32 to vector<32x128xf32>
    %4 = arith.subf %3, %2 : vector<32x128xf32>
    %5 = math.exp %4 : vector<32x128xf32>
    %cst_3 = arith.constant 1.000000e+00 : f32
    %6 = vector.broadcast %cst_3 : f32 to vector<32x128xf32>
    %7 = arith.addf %6, %5 : vector<32x128xf32>
    %8 = tpu.reciprocal %7 {approx = true} : vector<32x128xf32> -> vector<32x128xf32>
    %cst_4 = arith.constant 0.000000e+00 : f32
    %9 = vector.broadcast %cst_4 : f32 to vector<32x128xf32>
    %10 = arith.cmpf oge, %0, %9 : vector<32x128xf32>
    %11 = arith.mulf %5, %8 : vector<32x128xf32>
    %12 = arith.select %10, %8, %11 : vector<32x128xi1>, vector<32x128xf32>
    %cst_5 = arith.constant 0.000000e+00 : f32
    %13 = vector.broadcast %cst_5 : f32 to vector<32x128xf32>
    %14 = arith.maximumf %0, %13 : vector<32x128xf32>
    %15 = arith.mulf %0, %1 : vector<32x128xf32>
    %16 = arith.subf %14, %15 : vector<32x128xf32>
    %17 = math.log1p %5 : vector<32x128xf32>
    %18 = arith.addf %16, %17 : vector<32x128xf32>
    %19 = arith.mulf %12, %1 : vector<32x128xf32>
    %cst_6 = arith.constant 1.000000e+00 : f32
    %20 = vector.broadcast %cst_6 : f32 to vector<32x128xf32>
    %21 = arith.subf %20, %12 : vector<32x128xf32>
    %cst_7 = arith.constant 1.000000e+00 : f32
    %22 = vector.broadcast %cst_7 : f32 to vector<32x128xf32>
    %23 = arith.subf %22, %1 : vector<32x128xf32>
    %24 = arith.mulf %21, %23 : vector<32x128xf32>
    %25 = arith.addf %19, %24 : vector<32x128xf32>
    %cst_8 = arith.constant 1.000000e+00 : f32
    %26 = vector.broadcast %cst_8 : f32 to vector<32x128xf32>
    %27 = arith.subf %26, %25 : vector<32x128xf32>
    %28 = arith.mulf %27, %27 : vector<32x128xf32>
    %29 = arith.mulf %18, %28 : vector<32x128xf32>
    %cst_9 = arith.constant 2.500000e-01 : f32
    %30 = vector.broadcast %cst_9 : f32 to vector<32x128xf32>
    %31 = arith.mulf %30, %1 : vector<32x128xf32>
    %cst_10 = arith.constant 1.000000e+00 : f32
    %32 = vector.broadcast %cst_10 : f32 to vector<32x128xf32>
    %33 = arith.subf %32, %1 : vector<32x128xf32>
    %cst_11 = arith.constant 7.500000e-01 : f32
    %34 = vector.broadcast %cst_11 : f32 to vector<32x128xf32>
    %35 = arith.mulf %34, %33 : vector<32x128xf32>
    %36 = arith.addf %31, %35 : vector<32x128xf32>
    %37 = arith.mulf %36, %29 : vector<32x128xf32>
    %c0_i32 = arith.constant 0 : i32
    %38 = arith.cmpi ne, %arg0, %c0_i32 : i32
    %39 = arith.extui %38 : i1 to i32
    %c0_i32_12 = arith.constant 0 : i32
    %40 = arith.cmpi ne, %39, %c0_i32_12 : i32
    scf.if %40 {
      %44 = vector.shape_cast %37 : vector<32x128xf32> to vector<4x8x128xf32>
      %cst_15 = arith.constant dense<0.000000e+00> : vector<8x128xf32>
      %45 = vector.multi_reduction <add>, %44, %cst_15 [0] : vector<4x8x128xf32> to vector<8x128xf32>
      %c0_16 = arith.constant 0 : index
      %c0_17 = arith.constant 0 : index
      %c0_18 = arith.constant 0 : index
      %46 = vector.load %arg3[%c0_16, %c0_17, %c0_18] : memref<1x8x128xf32, #tpu.memory_space<vmem>>, vector<1x8x128xf32>
      %47 = vector.shape_cast %46 : vector<1x8x128xf32> to vector<8x128xf32>
      %48 = vector.shape_cast %45 : vector<8x128xf32> to vector<1x8x128xf32>
      tpu.vector_store %arg3[%c0_16, %c0_17, %c0_18], %48 {strides = array<i32>} : memref<1x8x128xf32, #tpu.memory_space<vmem>>, vector<1x8x128xf32>,
    } else {
    }
    %c0_i32_13 = arith.constant 0 : i32
    %41 = arith.cmpi eq, %arg0, %c0_i32_13 : i32
    %42 = arith.extui %41 : i1 to i32
    %c0_i32_14 = arith.constant 0 : i32
    %43 = arith.cmpi ne, %42, %c0_i32_14 : i32
    scf.if %43 {
      %44 = tpu.iota {dimensions = array<i32: 0>} : vector<32x128xi32>
      %45 = tpu.iota {dimensions = array<i32: 1>} : vector<32x128xi32>
      %c128_i32 = arith.constant 128 : i32
      %46 = vector.broadcast %c128_i32 : i32 to vector<32x128xi32>
      %47 = arith.muli %44, %46 : vector<32x128xi32>
      %48 = arith.addi %47, %45 : vector<32x128xi32>
      %c8_i32 = arith.constant 8 : i32
      %49 = vector.broadcast %c8_i32 : i32 to vector<32x128xi32>
      %50 = arith.cmpi slt, %48, %49 : vector<32x128xi32>
      %cst_15 = arith.constant 0.000000e+00 : f32
      %51 = vector.broadcast %cst_15 : f32 to vector<32x128xf32>
      %52 = arith.select %50, %37, %51 : vector<32x128xi1>, vector<32x128xf32>
      %53 = vector.shape_cast %52 : vector<32x128xf32> to vector<4x8x128xf32>
      %cst_16 = arith.constant dense<0.000000e+00> : vector<8x128xf32>
      %54 = vector.multi_reduction <add>, %53, %cst_16 [0] : vector<4x8x128xf32> to vector<8x128xf32>
      %c0_17 = arith.constant 0 : index
      %c0_18 = arith.constant 0 : index
      %c0_19 = arith.constant 0 : index
      %55 = vector.load %arg3[%c0_17, %c0_18, %c0_19] : memref<1x8x128xf32, #tpu.memory_space<vmem>>, vector<1x8x128xf32>
      %56 = vector.shape_cast %55 : vector<1x8x128xf32> to vector<8x128xf32>
      %57 = vector.shape_cast %54 : vector<8x128xf32> to vector<1x8x128xf32>
      tpu.vector_store %arg3[%c0_17, %c0_18, %c0_19], %57 {strides = array<i32>} : memref<1x8x128xf32, #tpu.memory_space<vmem>>, vector<1x8x128xf32>,
    } else {
    }
    return
  }
  func.func @transform_0(%arg0: i32) -> (i32, i32) {
    %c0_i32 = arith.constant 0 : i32
    %c0_i32_0 = arith.constant 0 : i32
    return %arg0, %c0_i32 : i32, i32
  }
  func.func @transform_1(%arg0: i32) -> (i32, i32) {
    %c0_i32 = arith.constant 0 : i32
    %c0_i32_0 = arith.constant 0 : i32
    return %arg0, %c0_i32 : i32, i32
  }
  func.func @transform_2(%arg0: i32) -> (i32, i32, i32) {
    %c0_i32 = arith.constant 0 : i32
    %c0_i32_0 = arith.constant 0 : i32
    %c0_i32_1 = arith.constant 0 : i32
    return %arg0, %c0_i32, %c0_i32_0 : i32, i32, i32
  }
}

</mosaic_0001>

<bundles_post_ra>
// kernel: tpu_custom_call.1
= control target key start
LH: loop header
LB: loop body
LE: loop exit
PB: predicated region body
PF: predicated region fallthrough
CT: control target
= control target key end

     0   :  { %7 = vsyncpa [#allocation3], 0  ;;  %s507_s0 = inlined_call_operand.hbm [shape: f32[1,128], index: 0, kind: input, shape index: {}]   ;;  %s508_s1 = inlined_call_operand.vmem [shape: f32[1,128], index: 1, kind: input, shape index: {}]   ;;  %s509_s2 = inlined_call_operand.hbm [shape: f32[1,8,128], index: 2, kind: output, shape index: {}]  }
   0x1   :  { %8 = vsyncpa [#allocation4], 0 }
   0x2   :  { %13 = vsyncadd [#allocation3], 496  ;;  %s300_s9 = smov [#allocation2]   ;;  %s252_s13 = scalar_lea.hbm %s507_s0, 16 }
   0x3   :  { %s14_s10 = sshll.u32 %s300_s9, 4  ;;  %p253_p0 = scmp.ne.s32.totalorder %s507_s0, %s252_s13  ;;  %s15_s10 = int_to_ptr.vmem [resolvable:$true] %s14_s10 }
   0x4   :  { %p256_p1 = scmp.lt.u32.totalorder %s252_s13, %s507_s0 }
   0x6   :  { %p258_p2 = pnand %p256_p1, %p253_p0 }
   0x8   :  { %261 = shalt.err (!%p258_p2)
}
   0x9   :  { %s262_s18 = scalar_lea.vmem %s15_s10, 16  ;;  %s266_s19 = scalar_lea.vmem %s15_s10, 512 }
   0xa   :  { %p263_p3 = scmp.ne.s32.totalorder %s15_s10, %s262_s18  ;;  %p267_p4 = scmp.lt.s32.totalorder %s15_s10, %s15_s10 }
   0xb   :  { %p268_p5 = scmp.lt.s32.totalorder %s266_s19, %s262_s18 }
   0xd   :  { %p269_p6 = por %p268_p5, %p267_p4 }
   0xf   :  { %p270_p7 = pnand %p269_p6, %p263_p3 }
  0x11   :  { %273 = shalt.err (!%p270_p7)
}
  0x12   :  { %s301_s20 = smov 16   ;;  %s302_s21 = smov 1  }
  0x13   :  { %20 = dma.hbm_to_vmem [thread:$0]  %s507_s0, 16, %s15_s10, [#allocation3], %s301_s20, %s301_s20, %s302_s21  }
  0x14   :  { %296 = dma.done.wait [#allocation3], 512  }
  0x15   :  { %297 = vsyncadd [#allocation3], 4294966784  ;;  %v331_v0 = vld [vmem:[#allocation2] sm:$0xff]  ;;  %v333_v1 = vld [vmem:[#allocation2 + $0x8] sm:$0xff]  ;;  %v182_v9 = vlaneseq }
  0x16   :  { %v335_v2 = vld [vmem:[#allocation2 + $0x10] sm:$0xff]  ;;  %v337_v3 = vld [vmem:[#allocation2 + $0x18] sm:$0xff]  ;;  %v34_v4 = vand.u32 2147483647, %v331_v0  ;;  %v35_v5 = vand.u32 2147483647, %v333_v1 }
  0x17   :  { %v36_v6 = vand.u32 2147483647, %v335_v2  ;;  %v37_v7 = vand.u32 2147483647, %v337_v3  ;;  %v183_v17 = vshrl.u32 %v182_v9, 7  ;;  %v345_v21 = vand.u32 127, %v182_v9 }
  0x18   :  { %v38_v8 = vsub.f32 0.0, %v34_v4  ;;  %v39_v10 = vsub.f32 0.0, %v35_v5  ;;  %v357_v29 = vld [vmem:[%s508_s1] sm:$0xff]  ;;  %v362_v30 = vld [vmem:[%s508_s1 + $0x8] sm:$0xff]  ;;  %v382_v39 = vld [vmem:[%s508_s1 + $0x10] sm:$0xff]  ;;  %v70_v41 = vmax.f32 %v331_v0, 0.0 }
  0x19   :  { %v40_v11 = vsub.f32 0.0, %v36_v6  ;;  %v41_v12 = vsub.f32 0.0, %v37_v7  ;;  %v184_v18 = vadd.s32 8, %v183_v17  ;;  %v185_v19 = vadd.s32 16, %v183_v17  ;;  %v390_v43 = vld [vmem:[%s508_s1 + $0x18] sm:$0xff]  ;;  %s303_s1 = smov [#allocation5]  }
  0x1a   :  { %v42_v13 = vmul.f32 1.442695, %v38_v8  ;;  %v44_v14 = vmul.f32 1.442695, %v39_v10  ;;  %v343_v20 = vadd.s32 24, %v183_v17  ;;  %v189_v22 = vmul.u32 128, %v183_v17 }
  0x1b   :  { %v46_v15 = vmul.f32 1.442695, %v40_v11  ;;  %v48_v16 = vmul.f32 1.442695, %v41_v12  ;;  %v190_v23 = vmul.u32 128, %v184_v18  ;;  %v191_v27 = vmul.u32 128, %v185_v19 }
  0x1c   :  { %228 = vpow2.f32 %v42_v13  ;;  %v192_v32 = vmul.u32 128, %v343_v20  ;;  %v367_v33 = vadd.s32 %v189_v22, %v345_v21  ;;  %v74_v37 = vmul.f32 %v357_v29, %v331_v0  ;;  %s215_s3 = sshll.u32 %s303_s1, 4  ;;  %s216_s3 = int_to_ptr.vmem [resolvable:$true] %s215_s3 }
  0x1d   :  { %230 = vpow2.f32 %v44_v14  ;;  %v370_v34 = vadd.s32 %v190_v23, %v345_v21  ;;  %v75_v38 = vmul.f32 %v362_v30, %v333_v1  ;;  %v71_v42 = vmax.f32 %v333_v1, 0.0  ;;  %s274_s4 = scalar_lea.vmem %s216_s3, 128  ;;  %p279_p9 = scmp.lt.s32.totalorder %s216_s3, %s216_s3 }
  0x1e   :  { %232 = vpow2.f32 %v46_v15  ;;  %vm58_vm0 = vcmp.ge.f32.partialorder %v331_v0, 0.0  ;;  %v72_v44 = vmax.f32 %v335_v2, 0.0  ;;  %v76_v45 = vmul.f32 %v382_v39, %v335_v2  ;;  %p275_p8 = scmp.ne.s32.totalorder %s216_s3, %s274_s4  ;;  %p280_p10 = scmp.lt.s32.totalorder %s274_s4, %s274_s4 }
  0x1f   :  { %234 = vpow2.f32 %v48_v16  ;;  %v397_v46 = vadd.s32 %v191_v27, %v345_v21  ;;  %vm59_vm1 = vcmp.ge.f32.partialorder %v333_v1, 0.0  ;;  %v73_v47 = vmax.f32 %v337_v3, 0.0 }
  0x20   :  { %v77_v48 = vmul.f32 %v390_v43, %v337_v3  ;;  %vm60_vm2 = vcmp.ge.f32.partialorder %v335_v2, 0.0  ;;  %vm61_vm3 = vcmp.ge.f32.partialorder %v337_v3, 0.0  ;;  %v407_v51 = vsub.f32 %v70_v41, %v74_v37  ;;  %p281_p11 = por %p280_p10, %p279_p9 }
  0x21   :  { %v409_v52 = vsub.f32 %v71_v42, %v75_v38  ;;  %v411_v53 = vsub.f32 %v72_v44, %v76_v45  ;;  %v130_v55 = vsub.f32 1.0, %v357_v29  ;;  %v131_v62 = vsub.f32 1.0, %v362_v30 }
  0x22   :  { %v415_v56 = vsub.f32 %v73_v47, %v77_v48  ;;  %v132_v4 = vsub.f32 1.0, %v382_v39  ;;  %v133_v5 = vsub.f32 1.0, %v390_v43  ;;  %v425_v6 = vmul.f32 0.25, %v357_v29  ;;  %p282_p12 = pnand %p281_p11, %p275_p8 }
  0x23   :  { %v428_v9 = vmul.f32 0.25, %v362_v30  ;;  %v431_v10 = vmul.f32 0.25, %v382_v39  ;;  %v434_v11 = vmul.f32 0.25, %v390_v43  ;;  %v158_v16 = vmul.f32 0.75, %v130_v55 }
  0x24   :  { %vm197_vm8 = vcmp.lt.s32.totalorder %v367_v33, 8  ;;  %vm198_vm9 = vcmp.lt.s32.totalorder %v370_v34, 8  ;;  %vm199_vm10 = vcmp.lt.s32.totalorder %v397_v46, 8 }
  0x26   :  { %v347_v24 = vpop.eup %228 }
  0x27   :  { %v349_v25 = vpop.eup %230  ;;  %v50_v26 = vadd.f32 1.0, %v347_v24  ;;  %v85_v49 = vmul.f32 -0.5, %v347_v24  ;;  %v88_v57 = vand.u32 2147483647, %v347_v24 }
  0x28   :  { %v352_v28 = vpop.eup %232  ;;  %v51_v31 = vadd.f32 1.0, %v349_v25  ;;  %v94_v50 = vmul.f32 -0.5, %v349_v25  ;;  %v97_v61 = vand.u32 2147483647, %v349_v25 }
  0x29   :  { %v372_v35 = vpop.eup %234  ;;  %v52_v36 = vadd.f32 1.0, %v352_v28  ;;  %236 = vrcp.f32 %v50_v26  ;;  %v103_v54 = vmul.f32 -0.5, %v352_v28  ;;  %v86_v59 = vadd.f32 1.0, %v85_v49 }
  0x2a   :  { %v53_v40 = vadd.f32 1.0, %v372_v35  ;;  %238 = vrcp.f32 %v51_v31  ;;  %v112_v58 = vmul.f32 -0.5, %v372_v35  ;;  %v95_v60 = vadd.f32 1.0, %v94_v50 }
  0x2b   :  { %240 = vrcp.f32 %v52_v36  ;;  %v106_v63 = vand.u32 2147483647, %v352_v28  ;;  %v104_v8 = vadd.f32 1.0, %v103_v54  ;;  %vm437_vm4 = vcmp.lt.f32.partialorder %v88_v57, 0.0004427343 }
  0x2c   :  { %242 = vrcp.f32 %v53_v40  ;;  %v113_v15 = vadd.f32 1.0, %v112_v58  ;;  %v87_v19 = vmul.f32 %v347_v24, %v86_v59  ;;  %v96_v22 = vmul.f32 %v349_v25, %v95_v60 }
  0x2d   :  { %244 = vlog2.f32 %v50_v26  ;;  %vm444_vm5 = vcmp.lt.f32.partialorder %v97_v61, 0.0004427343  ;;  %vm451_vm6 = vcmp.lt.f32.partialorder %v106_v63, 0.0004427343  ;;  %v115_v37 = vand.u32 2147483647, %v372_v35 }
  0x2e   :  { %246 = vlog2.f32 %v51_v31  ;;  %v114_v45 = vmul.f32 %v372_v35, %v113_v15 }
  0x2f   :  { %248 = vlog2.f32 %v52_v36  ;;  %vm468_vm7 = vcmp.lt.f32.partialorder %v115_v37, 0.0004427343 }
  0x30   :  { %250 = vlog2.f32 %v53_v40  ;;  %v105_v40 = vmul.f32 %v352_v28, %v104_v8  ;;  %v159_v8 = vmul.f32 0.75, %v131_v62 }
  0x33   :  { %v237_v7 = vpop.eup %236 }
  0x34   :  { %v239_v12 = vpop.eup %238  ;;  %v62_v13 = vmul.f32 %v237_v7, %v347_v24 }
  0x35   :  { %v241_v17 = vpop.eup %240  ;;  %v63_v18 = vmul.f32 %v239_v12, %v349_v25 }
  0x36   :  { %v243_v26 = vpop.eup %242  ;;  %v64_v27 = vmul.f32 %v241_v17, %v352_v28  ;;  %v66_v31 = vsel %vm58_vm0, %v237_v7, %v62_v13 }
  0x37   :  { %v245_v38 = vpop.eup %244  ;;  %v65_v24 = vmul.f32 %v243_v26, %v372_v35  ;;  %v67_v25 = vsel %vm59_vm1, %v239_v12, %v63_v18  ;;  %v126_v41 = vsub.f32 1.0, %v66_v31  ;;  %v122_v54 = vmul.f32 %v66_v31, %v357_v29 }
  0x38   :  { %v247_v42 = vpop.eup %246  ;;  %v68_v0 = vsel %vm60_vm2, %v241_v17, %v64_v27  ;;  %v84_v44 = vmul.f32 0.6931472, %v245_v38  ;;  %v127_v47 = vsub.f32 1.0, %v67_v25  ;;  %v123_v28 = vmul.f32 %v67_v25, %v362_v30 }
  0x39   :  { %v249_v48 = vpop.eup %248  ;;  %v69_v49 = vsel %vm61_vm3, %v243_v26, %v65_v24  ;;  %v93_v50 = vmul.f32 0.6931472, %v247_v42  ;;  %v128_v1 = vsub.f32 1.0, %v68_v0  ;;  %v124_v59 = vmul.f32 %v68_v0, %v382_v39 }
  0x3a   :  { %v251_v57 = vpop.eup %250  ;;  %v102_v58 = vmul.f32 0.6931472, %v249_v48  ;;  %v129_v2 = vsub.f32 1.0, %v69_v49  ;;  %v125_v35 = vmul.f32 %v69_v49, %v390_v43  ;;  %v134_v3 = vmul.f32 %v130_v55, %v126_v41 }
  0x3b   :  { %v111_v60 = vmul.f32 0.6931472, %v251_v57  ;;  %v90_v63 = vsel %vm437_vm4, %v87_v19, %v84_v44  ;;  %v135_v29 = vmul.f32 %v131_v62, %v127_v47  ;;  %v136_v7 = vmul.f32 %v132_v4, %v128_v1 }
  0x3c   :  { %v99_v30 = vsel %vm444_vm5, %v96_v22, %v93_v50  ;;  %v108_v39 = vsel %vm451_vm6, %v105_v40, %v102_v58  ;;  %v137_v12 = vmul.f32 %v133_v5, %v129_v2  ;;  %v138_v13 = vadd.f32 %v134_v3, %v122_v54 }
  0x3d   :  { %v117_v15 = vsel %vm468_vm7, %v114_v45, %v111_v60  ;;  %v139_v17 = vadd.f32 %v135_v29, %v123_v28  ;;  %v140_v43 = vadd.f32 %v136_v7, %v124_v59  ;;  %v160_v55 = vmul.f32 0.75, %v132_v4 }
  0x3e   :  { %v118_v14 = vadd.f32 %v90_v63, %v407_v51  ;;  %v141_v18 = vadd.f32 %v137_v12, %v125_v35  ;;  %v142_v19 = vsub.f32 1.0, %v138_v13  ;;  %v161_v26 = vmul.f32 0.75, %v133_v5 }
  0x3f   :  { %v119_v62 = vadd.f32 %v99_v30, %v409_v52  ;;  %v120_v22 = vadd.f32 %v108_v39, %v411_v53  ;;  %v143_v23 = vsub.f32 1.0, %v139_v17  ;;  %v144_v27 = vsub.f32 1.0, %v140_v43 }
  0x40   :  { %v121_v31 = vadd.f32 %v117_v15, %v415_v56  ;;  %v145_v36 = vsub.f32 1.0, %v141_v18  ;;  %v146_v37 = vmul.f32 %v142_v19, %v142_v19  ;;  %v162_v38 = vadd.f32 %v158_v16, %v425_v6 }
  0x41   :  { %v147_v24 = vmul.f32 %v143_v23, %v143_v23  ;;  %v148_v25 = vmul.f32 %v144_v27, %v144_v27  ;;  %v163_v4 = vadd.f32 %v159_v8, %v428_v9  ;;  %v164_v51 = vadd.f32 %v160_v55, %v431_v10 }
  0x42   :  { %v149_v40 = vmul.f32 %v145_v36, %v145_v36  ;;  %v150_v5 = vmul.f32 %v146_v37, %v118_v14  ;;  %v165_v52 = vadd.f32 %v161_v26, %v434_v11  ;;  %v196_v53 = vadd.s32 %v192_v32, %v345_v21 }
  0x43   :  { %v151_v41 = vmul.f32 %v147_v24, %v119_v62  ;;  %v152_v56 = vmul.f32 %v148_v25, %v120_v22 }
  0x44   :  { %v153_v42 = vmul.f32 %v149_v40, %v121_v31  ;;  %v166_v6 = vmul.f32 %v162_v38, %v150_v5  ;;  %vm200_vm11 = vcmp.lt.s32.totalorder %v196_v53, 8 }
  0x45   :  { %v167_v9 = vmul.f32 %v163_v4, %v151_v41  ;;  %v168_v10 = vmul.f32 %v164_v51, %v152_v56 }
  0x46   :  { %v169_v16 = vmul.f32 %v165_v52, %v153_v42  ;;  %v201_v0 = vsel %vm197_vm8, %v166_v6, 0.0 }
  0x47   :  { %v202_v11 = vsel %vm198_vm9, %v167_v9, 0.0  ;;  %v203_v44 = vsel %vm199_vm10, %v168_v10, 0.0 }
  0x48   :  { %v205_v45 = vadd.f32 %v202_v11, %v201_v0  ;;  %v204_v20 = vsel %vm200_vm11, %v169_v16, 0.0 }
  0x4a   :  { %v206_v21 = vadd.f32 %v205_v45, %v203_v44 }
  0x4c   :  { %v207_v32 = vadd.f32 %v206_v21, %v204_v20 }
  0x4e   :  { %208 = vst [vmem:[#allocation5] sm:$0xff] %v207_v32 }
  0x4f   :  { %285 = shalt.err (!%p282_p12)
}
  0x50   :  { %s286_s7 = scalar_lea.hbm %s509_s2, 128 }
  0x51   :  { %p287_p13 = scmp.ne.s32.totalorder %s509_s2, %s286_s7  ;;  %p290_p0 = scmp.lt.u32.totalorder %s286_s7, %s509_s2 }
  0x53   :  { %p292_p1 = pnand %p290_p0, %p287_p13 }
  0x55   :  { %295 = shalt.err (!%p292_p1)
}
  0x56   :  { %218 = dma.vmem_to_hbm [thread:$0]  %s216_s3, 128, %s509_s2, [#allocation4]  }
  0x57   :  { %298 = dma.done.wait [#allocation4], 128  }
  0x58   :  { %299 = vsyncadd [#allocation4], 4294967168 }
  0x59   :  { %222 = vsyncpa [#allocation3], 1 }
  0x5a   :  { %223 = vsyncpa [#allocation4], 1 }

</bundles_post_ra>
